<compile_context>
chip_gen: v7x
topology: tpu7x:2x2x1
jax: 0.10.0
libtpu: 0.0.40
codegen_flags: <defaults>
</compile_context>

<pallas_src>
import functools
import math

import jax
import jax.numpy as jnp
from jax.experimental import pallas as pl
from jax.experimental.pallas import tpu as pltpu

EPS = 1e-5


# ---------------------------------------------------------------------------
# Kernels
# ---------------------------------------------------------------------------

def _layernorm_rowwise_kernel(x_ref, *refs, eps, has_bias):
    # x_ref: (tm, D)   w_ref/b_ref: (1, D)   o_ref: (tm, D)
    if has_bias:
        w_ref, b_ref, o_ref = refs
    else:
        w_ref, o_ref = refs
        b_ref = None
    x = x_ref[...].astype(jnp.float32)
    d = x.shape[-1]
    inv_d = 1.0 / d
    mean = jnp.sum(x, axis=-1, keepdims=True) * inv_d
    xc = x - mean
    var = jnp.sum(xc * xc, axis=-1, keepdims=True) * inv_d  # biased, as in F.layer_norm
    y = xc * jax.lax.rsqrt(var + eps)
    y = y * w_ref[...].astype(jnp.float32)
    if has_bias:
        y = y + b_ref[...].astype(jnp.float32)
    o_ref[...] = y.astype(o_ref.dtype)


def _seg_sum(a, seg_bf16, *, exact):
    """Per-segment lane sums of f32 `a` via MXU matmul against a 0/1 bf16 matrix.

    exact=True: split `a` into 3 bf16 components (covers ~24 mantissa bits) so
    the result stays at ~f32 accuracy. exact=False: single bf16 matmul (enough
    when the input / output dtype is bf16/fp16).
    """
    if not exact:
        return jnp.dot(a.astype(jnp.bfloat16), seg_bf16,
                       preferred_element_type=jnp.float32)
    a0 = a.astype(jnp.bfloat16)
    r0 = a - a0.astype(jnp.float32)
    a1 = r0.astype(jnp.bfloat16)
    a2 = (r0 - a1.astype(jnp.float32)).astype(jnp.bfloat16)
    acc = jnp.dot(a0, seg_bf16, preferred_element_type=jnp.float32)
    acc = acc + jnp.dot(a1, seg_bf16, preferred_element_type=jnp.float32)
    acc = acc + jnp.dot(a2, seg_bf16, preferred_element_type=jnp.float32)
    return acc


def _layernorm_packed_kernel(x_ref, seg_ref, *refs, d, eps, has_bias, exact_stats):
    # x_ref: (tm, 128) — each physical row packs 128//d logical rows of width d.
    # seg_ref: (128, 128) bf16 block-diagonal 0/1 constant.
    # w_ref/b_ref: (1, 128) — weight/bias tiled 128//d times.
    if has_bias:
        w_ref, b_ref, o_ref = refs
    else:
        w_ref, o_ref = refs
        b_ref = None
    x = x_ref[...].astype(jnp.float32)
    seg = seg_ref[...]
    inv_d = 1.0 / d
    # Two-pass (centered) statistics on the otherwise-idle MXU.
    mean = _seg_sum(x, seg, exact=exact_stats) * inv_d
    xc = x - mean
    var = _seg_sum(xc * xc, seg, exact=exact_stats) * inv_d
    y = xc * jax.lax.rsqrt(var + eps)
    y = y * w_ref[...].astype(jnp.float32)
    if has_bias:
        y = y + b_ref[...].astype(jnp.float32)
    o_ref[...] = y.astype(o_ref.dtype)


# ---------------------------------------------------------------------------
# Host-side sizing helpers
# ---------------------------------------------------------------------------

def _physical_vmem_bytes():
    """Per-TensorCore VMEM, clamped to [32 MiB, 128 MiB] (64 MiB default, v7x)."""
    phys = 64 << 20
    try:
        info = pltpu.get_tpu_info()
        phys = int(getattr(info, "vmem_capacity_bytes", phys))
    except Exception:
        pass
    return max(32 << 20, min(phys, 128 << 20))


def _choose_tile_rows(n_rows, dp, itemsize, phys_vmem):
    """Pick the row tile: dtype-native sublane multiple, VMEM- and block-byte-
    bounded, and with enough grid steps for per-core double buffering."""
    sub = max(8, 32 // itemsize)           # 8 f32 / 16 bf16 / 32 int8
    if n_rows <= sub:
        return n_rows                       # block == full dim is always legal

    vmem_limit = max(32 << 20, phys_vmem // 2)
    budget = vmem_limit // 2                # headroom for compiler scratch
    # 2x double-buffered (in + out) tiles in native dtype + ~3 f32 temporaries
    # (x cast, xc, y) live in the body.
    per_row = 4 * dp * itemsize + 12 * dp
    tm_vmem = budget // per_row
    tm_block = (8 << 20) // (dp * itemsize)  # <= 8 MiB per buffered input block
    tm = min(tm_vmem, tm_block)

    # Keep >= 4 grid steps (>= 2 per v7x TensorCore) when there is enough work,
    # otherwise >= 2 steps for intra-core DMA/compute overlap.
    if n_rows >= 8 * sub:
        tm = min(tm, (n_rows // 4 // sub) * sub)
    elif n_rows >= 2 * sub:
        tm = min(tm, (n_rows // 2 // sub) * sub)

    tm = min(tm, (n_rows // sub) * sub)
    tm = max(sub, (tm // sub) * sub)
    return tm


def _make_seg(d, dp):
    lane = jnp.arange(dp) // d
    return (lane[:, None] == lane[None, :]).astype(jnp.bfloat16)


# ---------------------------------------------------------------------------
# Public wrapper
# ---------------------------------------------------------------------------

def layer_norm_pallas(x, weight, bias=None, *, eps=EPS):
    """LayerNorm over the last dim of x. weight/bias have shape (x.shape[-1],)."""
    orig_shape = x.shape
    d = orig_shape[-1]
    rows = int(math.prod(orig_shape[:-1])) if len(orig_shape) > 1 else 1
    has_bias = bias is not None

    # Lane-dense packing for small hidden sizes (full-lane loads/stores).
    pack = 1
    if d < 128 and 128 % d == 0:
        pack = 128 // d

    x_flat = x.reshape(rows, d)
    pad_rows = (-rows) % pack
    if pad_rows:
        # Keep the lane-dense path even when rows isn't a pack multiple;
        # padded logical rows are sliced off after the kernel.
        x_flat = jnp.pad(x_flat, ((0, pad_rows), (0, 0)))
    total_rows = rows + pad_rows
    n_rows = total_rows // pack
    dp = d * pack

    x2 = x_flat.reshape(n_rows, dp)
    w2 = (jnp.tile(weight, pack) if pack > 1 else weight).reshape(1, dp)
    b2 = None
    if has_bias:
        b2 = (jnp.tile(bias, pack) if pack > 1 else bias).reshape(1, dp)

    itemsize = jnp.dtype(x.dtype).itemsize
    phys_vmem = _physical_vmem_bytes()
    tm = _choose_tile_rows(n_rows, dp, itemsize, phys_vmem)
    grid = (pl.cdiv(n_rows, tm),)
    vmem_limit = int(max(32 << 20, phys_vmem // 2))

    # --- Specs / args (bias only if present — no fake zeros DMA).
    in_specs = [pl.BlockSpec((tm, dp), lambda i: (i, 0))]
    args = [x2]
    if pack > 1:
        in_specs.append(pl.BlockSpec((dp, dp), lambda i: (0, 0)))
        args.append(_make_seg(d, dp))
    in_specs.append(pl.BlockSpec((1, dp), lambda i: (0, 0)))
    args.append(w2)
    if has_bias:
        in_specs.append(pl.BlockSpec((1, dp), lambda i: (0, 0)))
        args.append(b2)

    exact_stats = itemsize >= 4  # bf16/fp16 inputs don't need the 3-way split
    if pack > 1:
        kernel = functools.partial(_layernorm_packed_kernel, d=d, eps=eps,
                                   has_bias=has_bias, exact_stats=exact_stats)
    else:
        kernel = functools.partial(_layernorm_rowwise_kernel, eps=eps,
                                   has_bias=has_bias)

    bytes_accessed = int((2 * n_rows * dp + (1 + int(has_bias)) * dp) * itemsize)
    cost = pl.CostEstimate(
        flops=int(12 * n_rows * dp),
        transcendentals=int(n_rows * pack),
        bytes_accessed=bytes_accessed,
    )

    out = pl.pallas_call(
        kernel,
        out_shape=jax.ShapeDtypeStruct((n_rows, dp), x.dtype),
        grid_spec=pltpu.PrefetchScalarGridSpec(
            num_scalar_prefetch=0,
            grid=grid,
            in_specs=in_specs,
            out_specs=pl.BlockSpec((tm, dp), lambda i: (i, 0)),
        ),
        compiler_params=pltpu.CompilerParams(
            dimension_semantics=("parallel",),
            vmem_limit_bytes=vmem_limit,
        ),
        cost_estimate=cost,
    )(*args)

    out = out.reshape(total_rows, d)
    if pad_rows:
        out = out[:rows]
    return out.reshape(orig_shape)


# ---------------------------------------------------------------------------
# Self-test
# ---------------------------------------------------------------------------

if __name__ == "__main__":
    key = jax.random.PRNGKey(0)
    kx, kw, kb, kx2, kw2, kx3 = jax.random.split(key, 6)

    def ref_ln(x, w, b, eps=EPS):
        mean = jnp.mean(x, axis=-1, keepdims=True)
        var = jnp.mean((x - mean) ** 2, axis=-1, keepdims=True)
        y = (x - mean) * jax.lax.rsqrt(var + eps) * w
        return y + b if b is not None else y

    # Module config: LayerNorm(ndim=32, bias=True)
    batch, seq, hidden = 2, 8, 32
    x = jax.random.normal(kx, (batch, seq, hidden), dtype=jnp.float32)
    weight = jnp.ones((hidden,), jnp.float32) + 0.01 * jax.random.normal(kw, (hidden,))
    bias = jnp.zeros((hidden,), jnp.float32) + 0.01 * jax.random.normal(kb, (hidden,))

    # 1) bias=True, small hidden -> lane-dense packed path
    out = jax.block_until_ready(layer_norm_pallas(x, weight, bias))
    assert out.shape == x.shape
    assert jnp.allclose(out, ref_ln(x, weight, bias), atol=1e-5, rtol=1e-5), "packed+bias mismatch"

    # 2) bias=False (the module's optional-bias branch)
    out_nb = jax.block_until_ready(layer_norm_pallas(x, weight, None))
    assert jnp.allclose(out_nb, ref_ln(x, weight, None), atol=1e-5, rtol=1e-5), "no-bias mismatch"

    # 3) lane-aligned hidden (row-wise path, multi-step grid)
    hidden2 = 128
    x_b = jax.random.normal(kx2, (batch, seq, hidden2), dtype=jnp.float32)
    w_b = jnp.ones((hidden2,), jnp.float32) + 0.01 * jax.random.normal(kw2, (hidden2,))
    out_b = jax.block_until_ready(layer_norm_pallas(x_b, w_b, None))
    assert jnp.allclose(out_b, ref_ln(x_b, w_b, None), atol=1e-5, rtol=1e-5), "rowwise mismatch"

    # 4) small hidden with row count not divisible by the pack factor
    x_c = jax.random.normal(kx3, (3, 5, hidden), dtype=jnp.float32)  # 15 rows, pack=4
    out_c = jax.block_until_ready(layer_norm_pallas(x_c, weight, bias))
    assert jnp.allclose(out_c, ref_ln(x_c, weight, bias), atol=1e-5, rtol=1e-5), "padded-pack mismatch"

    print("KERNEL_OK")
</pallas_src>

<mosaic_0001>
module attributes {stable_mosaic.version = 11 : i64} {
  func.func @_layernorm_packed_kernel(%arg0: i32, %arg1: memref<4x128xf32, #tpu.memory_space<vmem>>, %arg2: memref<128x128xbf16, #tpu.memory_space<vmem>>, %arg3: memref<1x128xf32, #tpu.memory_space<vmem>>, %arg4: memref<1x128xf32, #tpu.memory_space<vmem>>, %arg5: memref<4x128xf32, #tpu.memory_space<vmem>>) attributes {dimension_semantics = [#tpu.dimension_semantics<parallel>], iteration_bounds = array<i64: 1>, scalar_prefetch = 0 : i64, scratch_operands = 0 : i64, tpu.core_type = #tpu.core_type<tc>, window_params = [{transform_indices = @transform_0, window_bounds = array<i64: 4, 128>}, {pipeline_mode = #tpu.pipeline_mode<synchronous>, transform_indices = @transform_1, window_bounds = array<i64: 128, 128>}, {pipeline_mode = #tpu.pipeline_mode<synchronous>, transform_indices = @transform_2, window_bounds = array<i64: 1, 128>}, {pipeline_mode = #tpu.pipeline_mode<synchronous>, transform_indices = @transform_3, window_bounds = array<i64: 1, 128>}, {transform_indices = @transform_4, window_bounds = array<i64: 4, 128>}]} {
    %c0 = arith.constant 0 : index
    %c0_0 = arith.constant 0 : index
    %0 = vector.load %arg1[%c0, %c0_0] : memref<4x128xf32, #tpu.memory_space<vmem>>, vector<4x128xf32>
    %c0_1 = arith.constant 0 : index
    %c0_2 = arith.constant 0 : index
    %1 = vector.load %arg2[%c0_1, %c0_2] : memref<128x128xbf16, #tpu.memory_space<vmem>>, vector<128x128xbf16>
    %2 = arith.truncf %0 : vector<4x128xf32> to vector<4x128xbf16>
    %3 = arith.extf %2 : vector<4x128xbf16> to vector<4x128xf32>
    %4 = arith.subf %0, %3 : vector<4x128xf32>
    %5 = arith.truncf %4 : vector<4x128xf32> to vector<4x128xbf16>
    %6 = arith.extf %5 : vector<4x128xbf16> to vector<4x128xf32>
    %7 = arith.subf %4, %6 : vector<4x128xf32>
    %8 = arith.truncf %7 : vector<4x128xf32> to vector<4x128xbf16>
    %cst = arith.constant dense<0.000000e+00> : vector<4x128xf32>
    %9 = tpu.matmul %2, %1, %cst {dimension_numbers = #tpu.dot_dimension_numbers<[1], [0], [0], [1], [0, 0, 1, 1], [], []>} : vector<4x128xbf16>, vector<128x128xbf16>, vector<4x128xf32> -> vector<4x128xf32>
    %cst_3 = arith.constant dense<0.000000e+00> : vector<4x128xf32>
    %10 = tpu.matmul %5, %1, %cst_3 {dimension_numbers = #tpu.dot_dimension_numbers<[1], [0], [0], [1], [0, 0, 1, 1], [], []>} : vector<4x128xbf16>, vector<128x128xbf16>, vector<4x128xf32> -> vector<4x128xf32>
    %11 = arith.addf %9, %10 : vector<4x128xf32>
    %cst_4 = arith.constant dense<0.000000e+00> : vector<4x128xf32>
    %12 = tpu.matmul %8, %1, %cst_4 {dimension_numbers = #tpu.dot_dimension_numbers<[1], [0], [0], [1], [0, 0, 1, 1], [], []>} : vector<4x128xbf16>, vector<128x128xbf16>, vector<4x128xf32> -> vector<4x128xf32>
    %13 = arith.addf %11, %12 : vector<4x128xf32>
    %cst_5 = arith.constant 3.125000e-02 : f32
    %14 = vector.broadcast %cst_5 : f32 to vector<4x128xf32>
    %15 = arith.mulf %13, %14 : vector<4x128xf32>
    %16 = arith.subf %0, %15 : vector<4x128xf32>
    %17 = arith.mulf %16, %16 : vector<4x128xf32>
    %18 = arith.truncf %17 : vector<4x128xf32> to vector<4x128xbf16>
    %19 = arith.extf %18 : vector<4x128xbf16> to vector<4x128xf32>
    %20 = arith.subf %17, %19 : vector<4x128xf32>
    %21 = arith.truncf %20 : vector<4x128xf32> to vector<4x128xbf16>
    %22 = arith.extf %21 : vector<4x128xbf16> to vector<4x128xf32>
    %23 = arith.subf %20, %22 : vector<4x128xf32>
    %24 = arith.truncf %23 : vector<4x128xf32> to vector<4x128xbf16>
    %cst_6 = arith.constant dense<0.000000e+00> : vector<4x128xf32>
    %25 = tpu.matmul %18, %1, %cst_6 {dimension_numbers = #tpu.dot_dimension_numbers<[1], [0], [0], [1], [0, 0, 1, 1], [], []>} : vector<4x128xbf16>, vector<128x128xbf16>, vector<4x128xf32> -> vector<4x128xf32>
    %cst_7 = arith.constant dense<0.000000e+00> : vector<4x128xf32>
    %26 = tpu.matmul %21, %1, %cst_7 {dimension_numbers = #tpu.dot_dimension_numbers<[1], [0], [0], [1], [0, 0, 1, 1], [], []>} : vector<4x128xbf16>, vector<128x128xbf16>, vector<4x128xf32> -> vector<4x128xf32>
    %27 = arith.addf %25, %26 : vector<4x128xf32>
    %cst_8 = arith.constant dense<0.000000e+00> : vector<4x128xf32>
    %28 = tpu.matmul %24, %1, %cst_8 {dimension_numbers = #tpu.dot_dimension_numbers<[1], [0], [0], [1], [0, 0, 1, 1], [], []>} : vector<4x128xbf16>, vector<128x128xbf16>, vector<4x128xf32> -> vector<4x128xf32>
    %29 = arith.addf %27, %28 : vector<4x128xf32>
    %cst_9 = arith.constant 3.125000e-02 : f32
    %30 = vector.broadcast %cst_9 : f32 to vector<4x128xf32>
    %31 = arith.mulf %29, %30 : vector<4x128xf32>
    %cst_10 = arith.constant 9.99999974E-6 : f32
    %32 = vector.broadcast %cst_10 : f32 to vector<4x128xf32>
    %33 = arith.addf %31, %32 : vector<4x128xf32>
    %34 = math.rsqrt %33 : vector<4x128xf32>
    %35 = arith.mulf %16, %34 : vector<4x128xf32>
    %c0_11 = arith.constant 0 : index
    %c0_12 = arith.constant 0 : index
    %36 = vector.load %arg3[%c0_11, %c0_12] : memref<1x128xf32, #tpu.memory_space<vmem>>, vector<1x128xf32>
    %37 = vector.broadcast %36 : vector<1x128xf32> to vector<4x128xf32>
    %38 = arith.mulf %35, %37 : vector<4x128xf32>
    %c0_13 = arith.constant 0 : index
    %c0_14 = arith.constant 0 : index
    %39 = vector.load %arg4[%c0_13, %c0_14] : memref<1x128xf32, #tpu.memory_space<vmem>>, vector<1x128xf32>
    %40 = vector.broadcast %39 : vector<1x128xf32> to vector<4x128xf32>
    %41 = arith.addf %38, %40 : vector<4x128xf32>
    %c0_15 = arith.constant 0 : index
    %c0_16 = arith.constant 0 : index
    %42 = vector.load %arg5[%c0_15, %c0_16] : memref<4x128xf32, #tpu.memory_space<vmem>>, vector<4x128xf32>
    tpu.vector_store %arg5[%c0_15, %c0_16], %41 {strides = array<i32>} : memref<4x128xf32, #tpu.memory_space<vmem>>, vector<4x128xf32>,
    return
  }
  func.func @transform_0(%arg0: i32) -> (i32, i32) {
    %c0_i32 = arith.constant 0 : i32
    %c0_i32_0 = arith.constant 0 : i32
    return %arg0, %c0_i32 : i32, i32
  }
  func.func @transform_1(%arg0: i32) -> (i32, i32) {
    %c0_i32 = arith.constant 0 : i32
    %c0_i32_0 = arith.constant 0 : i32
    %c0_i32_1 = arith.constant 0 : i32
    return %c0_i32, %c0_i32_0 : i32, i32
  }
  func.func @transform_2(%arg0: i32) -> (i32, i32) {
    %c0_i32 = arith.constant 0 : i32
    %c0_i32_0 = arith.constant 0 : i32
    %c0_i32_1 = arith.constant 0 : i32
    return %c0_i32, %c0_i32_0 : i32, i32
  }
  func.func @transform_3(%arg0: i32) -> (i32, i32) {
    %c0_i32 = arith.constant 0 : i32
    %c0_i32_0 = arith.constant 0 : i32
    %c0_i32_1 = arith.constant 0 : i32
    return %c0_i32, %c0_i32_0 : i32, i32
  }
  func.func @transform_4(%arg0: i32) -> (i32, i32) {
    %c0_i32 = arith.constant 0 : i32
    %c0_i32_0 = arith.constant 0 : i32
    return %arg0, %c0_i32 : i32, i32
  }
}

</mosaic_0001>

<bundles_post_ra>
// kernel: tpu_custom_call.1
= control target key start
LH: loop header
LB: loop body
LE: loop exit
PB: predicated region body
PF: predicated region fallthrough
CT: control target
= control target key end

     0   :  { %9 = vsyncpa [#allocation3], 0  ;;  %s906_s0 = inlined_call_operand.hbm [shape: f32[4,128], index: 0, kind: input, shape index: {}]   ;;  %s907_s1 = inlined_call_operand.hbm [shape: bf16[128,128], index: 1, kind: input, shape index: {}]   ;;  %s908_s2 = inlined_call_operand.vmem [shape: f32[1,128], index: 2, kind: input, shape index: {}]   ;;  %s909_s3 = inlined_call_operand.vmem [shape: f32[1,128], index: 3, kind: input, shape index: {}]   ;;  %s910_s4 = inlined_call_operand.hbm [shape: f32[4,128], index: 4, kind: output, shape index: {}]  }
   0x1   :  { %10 = vsyncpa [#allocation6], 0 }
   0x2   :  { %11 = vsyncpa [#allocation4], 0  ;;  %s695_s15 = smov [#allocation2]   ;;  %s696_s17 = smov [#allocation5]  }
   0x3   :  { %s18_s16 = sshll.u32 %s695_s15, 4  ;;  %s27_s18 = sshll.u32 %s696_s17, 4  ;;  %s19_s16 = int_to_ptr.vmem [resolvable:$true] %s18_s16  ;;  %s727_s18 = int_to_ptr.vmem [resolvable:$true] %s27_s18 }
   0x4   :  { %s623_s21 = scalar_lea.hbm %s906_s0, 64 }
   0x5   :  { %p624_p0 = scmp.ne.s32.totalorder %s906_s0, %s623_s21  ;;  %p627_p1 = scmp.lt.u32.totalorder %s623_s21, %s906_s0 }
   0x7   :  { %p629_p2 = pnand %p627_p1, %p624_p0 }
   0x9   :  { %632 = shalt.err (!%p629_p2)
}
   0xa   :  { %s633_s26 = scalar_lea.vmem %s19_s16, 64  ;;  %p638_p4 = scmp.lt.s32.totalorder %s19_s16, %s19_s16 }
   0xb   :  { %p634_p3 = scmp.ne.s32.totalorder %s19_s16, %s633_s26  ;;  %p639_p5 = scmp.lt.s32.totalorder %s633_s26, %s633_s26 }
   0xd   :  { %p640_p6 = por %p639_p5, %p638_p4 }
   0xf   :  { %p641_p7 = pnand %p640_p6, %p634_p3 }
  0x11   :  { %644 = shalt.err (!%p641_p7)
}
  0x12   :  { %21 = dma.hbm_to_vmem [thread:$0]  %s906_s0, 64, %s19_s16, [#allocation3]  }
  0x13   :  { %s645_s5 = scalar_lea.hbm %s907_s1, 1024 }
  0x14   :  { %p646_p8 = scmp.ne.s32.totalorder %s907_s1, %s645_s5  ;;  %p649_p9 = scmp.lt.u32.totalorder %s645_s5, %s907_s1 }
  0x16   :  { %p651_p10 = pnand %p649_p9, %p646_p8 }
  0x18   :  { %654 = shalt.err (!%p651_p10)
}
  0x19   :  { %s655_s10 = scalar_lea.vmem %s727_s18, 1024  ;;  %p660_p12 = scmp.lt.s32.totalorder %s727_s18, %s727_s18 }
  0x1a   :  { %p656_p11 = scmp.ne.s32.totalorder %s727_s18, %s655_s10  ;;  %p661_p13 = scmp.lt.s32.totalorder %s655_s10, %s655_s10 }
  0x1c   :  { %p662_p0 = por %p661_p13, %p660_p12 }
  0x1e   :  { %p663_p1 = pnand %p662_p0, %p656_p11 }
  0x20   :  { %666 = shalt.err (!%p663_p1)
}
  0x21   :  { %s697_s0 = smov 64   ;;  %s698_s11 = smov 4  }
  0x22   :  { %33 = dma.hbm_to_vmem [thread:$0]  %s907_s1, 1024, %s727_s18, [#allocation6], %s697_s0, %s697_s0, %s698_s11  }
  0x23   :  { %689 = dma.done.wait [#allocation3], 64  }
  0x24   :  { %690 = vsyncadd [#allocation3], 4294967232 }
  0x25   :  { %691 = dma.done.wait [#allocation6], 1024  }
  0x26   :  { %692 = vsyncadd [#allocation6], 4294966272  ;;  %v699_v0 = vmov 0.0   ;;  %vm700_vm0 = vmmov 0   ;;  %v764_v1 = vld [vmem:[#allocation5] sm:$0xff]   ;;  %v767_v2 = vld [vmem:[#allocation5 + $0x8] sm:$0xff]  }
  0x27   :  { %470 = vmatprep.subr.bf16.mxu0 %v699_v0  ;;  %486 = vmatprep.mubr.msk.bf16.mxu0 %vm700_vm0, %v699_v0  ;;  %v773_v3 = vld [vmem:[#allocation5 + $0x10] sm:$0xff]   ;;  %v779_v4 = vld [vmem:[#allocation5 + $0x18] sm:$0xff]   ;;  %v785_v5 = vld [vmem:[#allocation5 + $0x20] sm:$0xff]   ;;  %s701_s17 = smov [#allocation7]  }
  0x28   :  { %530 = vmatprep.subr.bf16.mxu1 %v699_v0  ;;  %546 = vmatprep.mubr.msk.bf16.mxu1 %vm700_vm0, %v699_v0  ;;  %v787_v6 = vld [vmem:[#allocation2] sm:$0xf]  ;;  %v795_v8 = vld [vmem:[#allocation5 + $0x28] sm:$0xff]   ;;  %v801_v10 = vld [vmem:[#allocation5 + $0x30] sm:$0xff]   ;;  %s396_s18 = sshll.u32 %s701_s17, 4  ;;  %s397_s18 = int_to_ptr.vmem [resolvable:$true] %s396_s18 }
  0x29   :  { %471 = vmatpush3.bf16.msra.mxu0 %v764_v1  ;;  %531 = vmatpush3.bf16.msra.mxu1 %v764_v1  ;;  %v62_v7 = vpack.c.bf16 %v787_v6, %v787_v6  ;;  %v808_v12 = vld [vmem:[#allocation5 + $0x38] sm:$0xff]   ;;  %s667_s19 = scalar_lea.vmem %s397_s18, 64  ;;  %p672_p3 = scmp.lt.s32.totalorder %s397_s18, %s397_s18 }
  0x2a   :  { %472 = vmatprep.subr.bf16.mxu0 %v699_v0  ;;  %532 = vmatprep.subr.bf16.mxu1 %v699_v0  ;;  %v414_v38 = vld [vmem:[%s908_s2] ss:$0 sm:$0xff]  ;;  %p668_p2 = scmp.ne.s32.totalorder %s397_s18, %s667_s19  ;;  %p673_p4 = scmp.lt.s32.totalorder %s667_s19, %s667_s19 }
  0x2b   :  { %v63_v9 = vunpack.c.l.bf16 %v62_v7  ;;  %v415_v40 = vld [vmem:[%s909_s3] ss:$0 sm:$0xff] }
  0x2c   :  { %p674_p5 = por %p673_p4, %p672_p3 }
  0x2d   :  { %473 = vmatpush3.bf16.msra.mxu0 %v767_v2  ;;  %533 = vmatpush3.bf16.msra.mxu1 %v767_v2  ;;  %v64_v11 = vsub.f32 %v787_v6, %v63_v9 }
  0x2e   :  { %474 = vmatprep.subr.bf16.mxu0 %v699_v0  ;;  %534 = vmatprep.subr.bf16.mxu1 %v699_v0  ;;  %p675_p6 = pnand %p674_p5, %p668_p2 }
  0x2f   :  { %v65_v13 = vpack.c.bf16 %v64_v11, %v64_v11 }
  0x31   :  { %475 = vmatpush3.bf16.msra.mxu0 %v773_v3  ;;  %535 = vmatpush3.bf16.msra.mxu1 %v773_v3  ;;  %v66_v14 = vunpack.c.l.bf16 %v65_v13 }
  0x32   :  { %476 = vmatprep.subr.bf16.mxu0 %v699_v0  ;;  %536 = vmatprep.subr.bf16.mxu1 %v699_v0 }
  0x33   :  { %v67_v15 = vsub.f32 %v64_v11, %v66_v14 }
  0x35   :  { %477 = vmatpush3.bf16.msra.mxu0 %v779_v4  ;;  %537 = vmatpush3.bf16.msra.mxu1 %v779_v4  ;;  %v68_v16 = vpack.c.bf16 %v67_v15, %v67_v15 }
  0x36   :  { %478 = vmatprep.subr.bf16.mxu0 %v699_v0  ;;  %538 = vmatprep.subr.bf16.mxu1 %v699_v0 }
  0x39   :  { %479 = vmatpush3.bf16.msra.mxu0 %v785_v5  ;;  %539 = vmatpush3.bf16.msra.mxu1 %v785_v5 }
  0x3a   :  { %480 = vmatprep.subr.bf16.mxu0 %v699_v0  ;;  %540 = vmatprep.subr.bf16.mxu1 %v699_v0 }
  0x3d   :  { %481 = vmatpush3.bf16.msra.mxu0 %v795_v8  ;;  %541 = vmatpush3.bf16.msra.mxu1 %v795_v8 }
  0x3e   :  { %482 = vmatprep.subr.bf16.mxu0 %v699_v0  ;;  %542 = vmatprep.subr.bf16.mxu1 %v699_v0 }
  0x41   :  { %483 = vmatpush3.bf16.msra.mxu0 %v801_v10  ;;  %543 = vmatpush3.bf16.msra.mxu1 %v801_v10 }
  0x42   :  { %484 = vmatprep.subr.bf16.mxu0 %v699_v0  ;;  %544 = vmatprep.subr.bf16.mxu1 %v699_v0 }
  0x45   :  { %485 = vmatpush3.bf16.msra.mxu0 %v808_v12  ;;  %545 = vmatpush3.bf16.msra.mxu1 %v808_v12 }
  0x46   :  { %490 = vmatprep.subr.bf16.mxu0 %v699_v0  ;;  %550 = vmatprep.subr.bf16.mxu1 %v699_v0 }
  0x48   :  { %487 = vmatmul.mubr.bf16.vlgmr.msra.gmra.mrb[0].mxu0 %v65_v13 }
  0x49   :  { %491 = vmatpush3.bf16.msra.mxu0 %v764_v1  ;;  %506 = vmatprep.mubr.msk.bf16.mxu0 %vm700_vm0, %v699_v0 }
  0x4a   :  { %492 = vmatprep.subr.bf16.mxu0 %v699_v0 }
  0x4d   :  { %493 = vmatpush3.bf16.msra.mxu0 %v767_v2 }
  0x4e   :  { %494 = vmatprep.subr.bf16.mxu0 %v699_v0 }
  0x51   :  { %495 = vmatpush3.bf16.msra.mxu0 %v773_v3 }
  0x52   :  { %496 = vmatprep.subr.bf16.mxu0 %v699_v0 }
  0x55   :  { %497 = vmatpush3.bf16.msra.mxu0 %v779_v4 }
  0x56   :  { %498 = vmatprep.subr.bf16.mxu0 %v699_v0 }
  0x59   :  { %499 = vmatpush3.bf16.msra.mxu0 %v785_v5 }
  0x5a   :  { %500 = vmatprep.subr.bf16.mxu0 %v699_v0 }
  0x5d   :  { %501 = vmatpush3.bf16.msra.mxu0 %v795_v8 }
  0x5e   :  { %502 = vmatprep.subr.bf16.mxu0 %v699_v0 }
  0x61   :  { %503 = vmatpush3.bf16.msra.mxu0 %v801_v10 }
  0x62   :  { %504 = vmatprep.subr.bf16.mxu0 %v699_v0 }
  0x65   :  { %505 = vmatpush3.bf16.msra.mxu0 %v808_v12 }
  0x66   :  { %510 = vmatprep.subr.bf16.mxu0 %v699_v0 }
  0x68   :  { %507 = vmatmul.mubr.bf16.vlgmr.msra.gmra.mrb[0].mxu0 %v62_v7 }
  0x69   :  { %511 = vmatpush3.bf16.msra.mxu0 %v764_v1  ;;  %526 = vmatprep.mubr.msk.bf16.mxu0 %vm700_vm0, %v699_v0 }
  0x6a   :  { %512 = vmatprep.subr.bf16.mxu0 %v699_v0 }
  0x6d   :  { %513 = vmatpush3.bf16.msra.mxu0 %v767_v2 }
  0x6e   :  { %514 = vmatprep.subr.bf16.mxu0 %v699_v0 }
  0x71   :  { %515 = vmatpush3.bf16.msra.mxu0 %v773_v3 }
  0x72   :  { %516 = vmatprep.subr.bf16.mxu0 %v699_v0 }
  0x75   :  { %517 = vmatpush3.bf16.msra.mxu0 %v779_v4 }
  0x76   :  { %518 = vmatprep.subr.bf16.mxu0 %v699_v0 }
  0x79   :  { %519 = vmatpush3.bf16.msra.mxu0 %v785_v5 }
  0x7a   :  { %520 = vmatprep.subr.bf16.mxu0 %v699_v0 }
  0x7d   :  { %521 = vmatpush3.bf16.msra.mxu0 %v795_v8 }
  0x7e   :  { %522 = vmatprep.subr.bf16.mxu0 %v699_v0 }
  0x81   :  { %523 = vmatpush3.bf16.msra.mxu0 %v801_v10 }
  0x82   :  { %524 = vmatprep.subr.bf16.mxu0 %v699_v0 }
  0x85   :  { %525 = vmatpush3.bf16.msra.mxu0 %v808_v12 }
  0x88   :  { %527 = vmatmul.mubr.bf16.vlgmr.msra.gmra.mrb[0].mxu0 %v68_v16 }
 0x15b   :  { %v231_v17 = vpop.f32.mrb[0].mxu0 }
 0x15c   :  { %v238_v18 = vmul.f32 0.03125, %v231_v17  ;;  %v528_v19 = vpop.f32.mrb[1].mxu0 }
 0x15d   :  { %v234_v20 = vpop.f32.mrb[2].mxu0 }
 0x15e   :  { %v239_v21 = vsub.f32 %v787_v6, %v238_v18  ;;  %v529_v22 = vpop.f32.mrb[3].mxu0 }
 0x160   :  { %v240_v23 = vmul.f32 %v239_v21, %v239_v21 }
 0x162   :  { %v241_v24 = vpack.c.bf16 %v240_v23, %v240_v23 }
 0x164   :  { %v242_v25 = vunpack.c.l.bf16 %v241_v24 }
 0x166   :  { %v243_v26 = vsub.f32 %v240_v23, %v242_v25 }
 0x168   :  { %v244_v27 = vpack.c.bf16 %v243_v26, %v243_v26 }
 0x16a   :  { %547 = vmatmul.mubr.bf16.vlgmr.msra.gmra.mrb[0].mxu1 %v244_v27  ;;  %v245_v28 = vunpack.c.l.bf16 %v244_v27 }
 0x16b   :  { %551 = vmatpush3.bf16.msra.mxu1 %v764_v1  ;;  %566 = vmatprep.mubr.msk.bf16.mxu1 %vm700_vm0, %v699_v0 }
 0x16c   :  { %552 = vmatprep.subr.bf16.mxu1 %v699_v0  ;;  %v246_v29 = vsub.f32 %v243_v26, %v245_v28 }
 0x16e   :  { %v247_v30 = vpack.c.bf16 %v246_v29, %v246_v29 }
 0x16f   :  { %553 = vmatpush3.bf16.msra.mxu1 %v767_v2 }
 0x170   :  { %554 = vmatprep.subr.bf16.mxu1 %v699_v0 }
 0x173   :  { %555 = vmatpush3.bf16.msra.mxu1 %v773_v3 }
 0x174   :  { %556 = vmatprep.subr.bf16.mxu1 %v699_v0 }
 0x177   :  { %557 = vmatpush3.bf16.msra.mxu1 %v779_v4 }
 0x178   :  { %558 = vmatprep.subr.bf16.mxu1 %v699_v0 }
 0x17b   :  { %559 = vmatpush3.bf16.msra.mxu1 %v785_v5 }
 0x17c   :  { %560 = vmatprep.subr.bf16.mxu1 %v699_v0 }
 0x17f   :  { %561 = vmatpush3.bf16.msra.mxu1 %v795_v8 }
 0x180   :  { %562 = vmatprep.subr.bf16.mxu1 %v699_v0 }
 0x183   :  { %563 = vmatpush3.bf16.msra.mxu1 %v801_v10 }
 0x184   :  { %564 = vmatprep.subr.bf16.mxu1 %v699_v0 }
 0x187   :  { %565 = vmatpush3.bf16.msra.mxu1 %v808_v12 }
 0x188   :  { %570 = vmatprep.subr.bf16.mxu1 %v699_v0 }
 0x18a   :  { %567 = vmatmul.mubr.bf16.vlgmr.msra.gmra.mrb[0].mxu1 %v241_v24 }
 0x18b   :  { %571 = vmatpush3.bf16.msra.mxu1 %v764_v1  ;;  %586 = vmatprep.mubr.msk.bf16.mxu1 %vm700_vm0, %v699_v0 }
 0x18c   :  { %572 = vmatprep.subr.bf16.mxu1 %v699_v0 }
 0x18f   :  { %573 = vmatpush3.bf16.msra.mxu1 %v767_v2 }
 0x190   :  { %574 = vmatprep.subr.bf16.mxu1 %v699_v0 }
 0x193   :  { %575 = vmatpush3.bf16.msra.mxu1 %v773_v3 }
 0x194   :  { %576 = vmatprep.subr.bf16.mxu1 %v699_v0 }
 0x197   :  { %577 = vmatpush3.bf16.msra.mxu1 %v779_v4 }
 0x198   :  { %578 = vmatprep.subr.bf16.mxu1 %v699_v0 }
 0x19b   :  { %579 = vmatpush3.bf16.msra.mxu1 %v785_v5 }
 0x19c   :  { %580 = vmatprep.subr.bf16.mxu1 %v699_v0 }
 0x19f   :  { %581 = vmatpush3.bf16.msra.mxu1 %v795_v8 }
 0x1a0   :  { %582 = vmatprep.subr.bf16.mxu1 %v699_v0 }
 0x1a3   :  { %583 = vmatpush3.bf16.msra.mxu1 %v801_v10 }
 0x1a4   :  { %584 = vmatprep.subr.bf16.mxu1 %v699_v0 }
 0x1a7   :  { %585 = vmatpush3.bf16.msra.mxu1 %v808_v12 }
 0x1aa   :  { %587 = vmatmul.mubr.bf16.vlgmr.msra.gmra.mrb[0].mxu1 %v247_v30 }
 0x27d   :  { %v362_v31 = vpop.f32.mrb[0].mxu1 }
 0x27e   :  { %v369_v32 = vmul.f32 0.03125, %v362_v31  ;;  %v588_v33 = vpop.f32.mrb[1].mxu1 }
 0x27f   :  { %v365_v34 = vpop.f32.mrb[2].mxu1 }
 0x280   :  { %v370_v35 = vadd.f32 1e-05, %v369_v32  ;;  %v589_v36 = vpop.f32.mrb[3].mxu1 }
 0x282   :  { %621 = vrsqrt.f32 %v370_v35 }
 0x28c   :  { %v622_v37 = vpop.eup %621 }
 0x28d   :  { %v372_v39 = vmul.f32 %v622_v37, %v239_v21 }
 0x28f   :  { %v380_v41 = vmul.f32 %v414_v38, %v372_v39 }
 0x291   :  { %v388_v42 = vadd.f32 %v415_v40, %v380_v41 }
 0x293   :  { %389 = vst [vmem:[#allocation7] sm:$0xf] %v388_v42 }
 0x294   :  { %678 = shalt.err (!%p675_p6)
}
 0x295   :  { %s679_s21 = scalar_lea.hbm %s910_s4, 64 }
 0x296   :  { %p680_p7 = scmp.ne.s32.totalorder %s910_s4, %s679_s21  ;;  %p683_p8 = scmp.lt.u32.totalorder %s679_s21, %s910_s4 }
 0x298   :  { %p685_p9 = pnand %p683_p8, %p680_p7 }
 0x29a   :  { %688 = shalt.err (!%p685_p9)
}
 0x29b   :  { %399 = dma.vmem_to_hbm [thread:$0]  %s397_s18, 64, %s910_s4, [#allocation4]  }
 0x29c   :  { %693 = dma.done.wait [#allocation4], 64  }
 0x29d   :  { %694 = vsyncadd [#allocation4], 4294967232 }
 0x29e   :  { %403 = vsyncpa [#allocation3], 1 }
 0x29f   :  { %404 = vsyncpa [#allocation6], 1 }
 0x2a0   :  { %405 = vsyncpa [#allocation4], 1 }

</bundles_post_ra>
